<compile_context>
chip_gen: v5e
topology: v5e:2x2
jax: 0.10.0
libtpu: 0.0.40
codegen_flags: <defaults>
</compile_context>

<pallas_src>
import jax
import jax.numpy as jnp
from jax.experimental import pallas as pl
from jax.experimental.pallas import tpu as pltpu

LN_EPS = 1e-5  # nn.LayerNorm default


def _round_up(x, m):
    return ((x + m - 1) // m) * m


def _merge_kernel(x_ref, gb_ref, w_ref, o_ref):
    """Fused LayerNorm(8C) + Linear(8C -> Np, bias-free) on one row tile.

    x_ref:  (TM, K)   rows of merged patches (input dtype)
    gb_ref: (2, K)    row 0 = LayerNorm gamma, row 1 = beta (f32)
    w_ref:  (K, Np)   reduction weight, transposed + lane-padded (bf16)
    o_ref:  (TM, Np)  output tile (lane-dense: Np % 128 == 0)
    """
    x = x_ref[...].astype(jnp.float32)
    gb = gb_ref[...]  # already f32, no per-tile cast
    mean = jnp.mean(x, axis=-1, keepdims=True)
    xc = x - mean
    var = jnp.mean(xc * xc, axis=-1, keepdims=True)
    y = xc * jax.lax.rsqrt(var + LN_EPS) * gb[0:1, :] + gb[1:2, :]
    # Feed the MXU in bf16 (stats were computed in f32); accumulate in f32.
    o_ref[...] = jnp.dot(
        y.astype(w_ref.dtype),
        w_ref[...],
        preferred_element_type=jnp.float32,
    ).astype(o_ref.dtype)


def _pick_tile_m(n_rows, k, n_pad_cols, x_bytes, out_bytes, vmem_budget):
    """Largest row tile whose double-buffered working set fits the budget."""
    # Resident (double-buffered) bf16 weight + fused gamma/beta (f32).
    fixed = 2 * k * n_pad_cols * 2 + 2 * (2 * k * 4)
    tile = 16
    for tm in (1024, 512, 256, 128, 64, 32, 16):
        need = 2 * tm * k * x_bytes + 2 * tm * n_pad_cols * out_bytes + fixed
        if need <= vmem_budget:
            tile = tm
            break
    # Don't over-tile tiny inputs; keep a multiple of 16 (bf16 sublane packing,
    # also satisfies the f32 multiple-of-8 constraint).
    tile = min(tile, _round_up(n_rows, 16))
    return max(16, tile)


def _norm_reduce_pallas(x2d, gb, w_t_padded, n_out):
    """x2d: (N, 8C) -> (N, n_out) via LayerNorm + matmul, tiled over rows."""
    n, k = x2d.shape
    n_pad_cols = w_t_padded.shape[1]
    x_bytes = x2d.dtype.itemsize
    out_bytes = x2d.dtype.itemsize
    w_bytes = w_t_padded.dtype.itemsize

    # Budget well under v7x's 64 MiB physical VMEM (v5e/v6e have 128 MiB).
    vmem_budget = 44 * 1024 * 1024
    tile_m = _pick_tile_m(n, k, n_pad_cols, x_bytes, out_bytes, vmem_budget)

    n_rows_pad = _round_up(n, tile_m)
    if n_rows_pad != n:
        x2d = jnp.pad(x2d, ((0, n_rows_pad - n), (0, 0)))

    grid = (n_rows_pad // tile_m,)

    vmem_need = (
        2 * tile_m * k * x_bytes
        + 2 * tile_m * n_pad_cols * out_bytes
        + 2 * k * n_pad_cols * w_bytes
        + 2 * (2 * k * 4)
    )
    vmem_limit = int(
        min(64 * 1024 * 1024, max(32 * 1024 * 1024, vmem_need + (4 << 20)))
    )

    cost = pl.CostEstimate(
        flops=2 * n_rows_pad * k * n_pad_cols,
        transcendentals=n_rows_pad,  # one rsqrt per row
        bytes_accessed=(
            n_rows_pad * k * x_bytes
            + k * n_pad_cols * w_bytes
            + 2 * k * 4
            + n_rows_pad * n_pad_cols * out_bytes
        ),
    )

    out = pl.pallas_call(
        _merge_kernel,
        out_shape=jax.ShapeDtypeStruct((n_rows_pad, n_pad_cols), x2d.dtype),
        grid_spec=pltpu.PrefetchScalarGridSpec(
            num_scalar_prefetch=0,
            grid=grid,
            in_specs=[
                pl.BlockSpec((tile_m, k), lambda i: (i, 0)),
                pl.BlockSpec((2, k), lambda i: (0, 0)),
                pl.BlockSpec((k, n_pad_cols), lambda i: (0, 0)),
            ],
            out_specs=pl.BlockSpec((tile_m, n_pad_cols), lambda i: (i, 0)),
        ),
        compiler_params=pltpu.CompilerParams(
            dimension_semantics=("parallel",),
            vmem_limit_bytes=vmem_limit,
        ),
        cost_estimate=cost,
    )(x2d, gb, w_t_padded)

    return out[:n, :n_out]


def patch_merging_3d(x, H, W, D, gamma, beta, w_reduction):
    """Forward pass of PatchMerging3D.

    Args:
      x: (B, H*W*D, C) features.
      H, W, D: spatial resolution.
      gamma, beta: (8C,) LayerNorm params.
      w_reduction: (2C, 8C) Linear weight (PyTorch layout); no bias.
    Returns:
      (B, ceil(H/2)*ceil(W/2)*ceil(D/2), 2C)
    """
    B, L, C = x.shape
    assert L == H * W * D, "input feature has wrong size"
    x = x.reshape(B, H, W, D, C)

    # Pad odd dims (same as F.pad with (0,0, 0,D%2, 0,W%2, 0,H%2)).
    if (H % 2 == 1) or (W % 2 == 1) or (D % 2 == 1):
        x = jnp.pad(x, ((0, 0), (0, H % 2), (0, W % 2), (0, D % 2), (0, 0)))

    # 2x2x2 strided neighbor gather; concat order matches the PyTorch module.
    # TODO(synk): fusing this gather into the kernel via 8 offset BlockSpecs
    # needs size-1 blocks on the second-minor offset axes (violates the (8,128)
    # block constraint) or in-kernel multi-dim reshapes, so it stays as one XLA
    # fusion that materializes the (rows, 8C) slab once.
    x0 = x[:, 0::2, 0::2, 0::2, :]
    x1 = x[:, 1::2, 0::2, 0::2, :]
    x2 = x[:, 0::2, 1::2, 0::2, :]
    x3 = x[:, 1::2, 1::2, 0::2, :]
    x4 = x[:, 0::2, 0::2, 1::2, :]
    x5 = x[:, 1::2, 0::2, 1::2, :]
    x6 = x[:, 0::2, 1::2, 1::2, :]
    x7 = x[:, 1::2, 1::2, 1::2, :]
    xm = jnp.concatenate([x0, x1, x2, x3, x4, x5, x6, x7], axis=-1)  # (B,H2,W2,D2,8C)

    B_, H2, W2, D2, C8 = xm.shape
    n_rows = B_ * H2 * W2 * D2
    x2d = xm.reshape(n_rows, C8)

    n_out = w_reduction.shape[0]             # 2C
    n_pad_cols = _round_up(n_out, 128)       # lane-dense output stores

    # Fused LayerNorm affine params: one (2, 8C) f32 operand (one tiny DMA).
    gb = jnp.stack([gamma, beta], axis=0).astype(jnp.float32)

    # Weight: transpose to (8C, 2C), zero-pad the output dim to a multiple of
    # 128, and pre-cast to bf16 for the MXU.
    w_t = w_reduction.T
    if n_pad_cols != n_out:
        w_t = jnp.pad(w_t, ((0, 0), (0, n_pad_cols - n_out)))
    w_t = w_t.astype(jnp.bfloat16)

    out2d = _norm_reduce_pallas(x2d, gb, w_t, n_out)
    return out2d.reshape(B_, H2 * W2 * D2, n_out)


def _reference(x, H, W, D, gamma, beta, w_reduction):
    """Pure-JAX f32 reference (mirrors the PyTorch forward)."""
    B, L, C = x.shape
    x = x.reshape(B, H, W, D, C)
    if (H % 2 == 1) or (W % 2 == 1) or (D % 2 == 1):
        x = jnp.pad(x, ((0, 0), (0, H % 2), (0, W % 2), (0, D % 2), (0, 0)))
    parts = [
        x[:, 0::2, 0::2, 0::2, :], x[:, 1::2, 0::2, 0::2, :],
        x[:, 0::2, 1::2, 0::2, :], x[:, 1::2, 1::2, 0::2, :],
        x[:, 0::2, 0::2, 1::2, :], x[:, 1::2, 0::2, 1::2, :],
        x[:, 0::2, 1::2, 1::2, :], x[:, 1::2, 1::2, 1::2, :],
    ]
    xm = jnp.concatenate(parts, axis=-1)
    B_, H2, W2, D2, C8 = xm.shape
    xm = xm.reshape(B_, H2 * W2 * D2, C8).astype(jnp.float32)
    mean = jnp.mean(xm, axis=-1, keepdims=True)
    var = jnp.mean((xm - mean) ** 2, axis=-1, keepdims=True)
    xhat = (xm - mean) / jnp.sqrt(var + LN_EPS)
    y = xhat * gamma + beta
    return jnp.einsum("blk,ok->blo", y, w_reduction)


if __name__ == "__main__":
    key = jax.random.PRNGKey(0)
    k_x, k_w = jax.random.split(key)

    # dim (C) = 4, B = 2, H = W = D = 4  ->  L = 64
    B, H, W, D, C = 2, 4, 4, 4, 4
    x = jax.random.normal(k_x, (B, H * W * D, C), dtype=jnp.float32)

    # Parameters: LayerNorm default init + random Linear weight in PyTorch
    # (out_features, in_features) = (2C, 8C) layout, bias-free.
    gamma = jnp.ones((8 * C,), dtype=jnp.float32)
    beta = jnp.zeros((8 * C,), dtype=jnp.float32)
    w_reduction = (
        jax.random.normal(k_w, (2 * C, 8 * C), dtype=jnp.float32) * 0.05
    )

    out = patch_merging_3d(x, H, W, D, gamma, beta, w_reduction)
    out = jax.block_until_ready(out)

    ref = _reference(x, H, W, D, gamma, beta, w_reduction)
    assert out.shape == (B, (H // 2) * (W // 2) * (D // 2), 2 * C), out.shape
    # Kernel feeds the MXU in bf16 (f32 accumulation); compare against the
    # f32 reference with a tolerance that covers bf16 input rounding.
    max_err = float(jnp.max(jnp.abs(out - ref)))
    assert jnp.allclose(out, ref, atol=2e-2, rtol=2e-2), max_err
    print("KERNEL_OK")
</pallas_src>

<mosaic_0001>
module attributes {stable_mosaic.version = 11 : i64} {
  func.func @_merge_kernel(%arg0: i32, %arg1: memref<16x32xf32, #tpu.memory_space<vmem>>, %arg2: memref<2x32xf32, #tpu.memory_space<vmem>>, %arg3: memref<32x128xbf16, #tpu.memory_space<vmem>>, %arg4: memref<16x128xf32, #tpu.memory_space<vmem>>) attributes {dimension_semantics = [#tpu.dimension_semantics<parallel>], iteration_bounds = array<i64: 1>, scalar_prefetch = 0 : i64, scratch_operands = 0 : i64, tpu.core_type = #tpu.core_type<tc>, window_params = [{transform_indices = @transform_0, window_bounds = array<i64: 16, 32>}, {pipeline_mode = #tpu.pipeline_mode<synchronous>, transform_indices = @transform_1, window_bounds = array<i64: 2, 32>}, {pipeline_mode = #tpu.pipeline_mode<synchronous>, transform_indices = @transform_2, window_bounds = array<i64: 32, 128>}, {transform_indices = @transform_3, window_bounds = array<i64: 16, 128>}]} {
    %c0 = arith.constant 0 : index
    %c0_0 = arith.constant 0 : index
    %0 = vector.load %arg1[%c0, %c0_0] : memref<16x32xf32, #tpu.memory_space<vmem>>, vector<16x32xf32>
    %c0_1 = arith.constant 0 : index
    %c0_2 = arith.constant 0 : index
    %1 = vector.load %arg2[%c0_1, %c0_2] : memref<2x32xf32, #tpu.memory_space<vmem>>, vector<2x32xf32>
    %cst = arith.constant dense<0.000000e+00> : vector<16xf32>
    %2 = vector.multi_reduction <add>, %0, %cst [1] : vector<16x32xf32> to vector<16xf32>
    %3 = vector.shape_cast %2 : vector<16xf32> to vector<16x1xf32>
    %cst_3 = arith.constant 3.200000e+01 : f32
    %4 = vector.broadcast %cst_3 : f32 to vector<16x1xf32>
    %5 = arith.divf %3, %4 : vector<16x1xf32>
    %6 = vector.broadcast %5 : vector<16x1xf32> to vector<16x32xf32>
    %7 = arith.subf %0, %6 : vector<16x32xf32>
    %8 = arith.mulf %7, %7 : vector<16x32xf32>
    %cst_4 = arith.constant dense<0.000000e+00> : vector<16xf32>
    %9 = vector.multi_reduction <add>, %8, %cst_4 [1] : vector<16x32xf32> to vector<16xf32>
    %10 = vector.shape_cast %9 : vector<16xf32> to vector<16x1xf32>
    %cst_5 = arith.constant 3.200000e+01 : f32
    %11 = vector.broadcast %cst_5 : f32 to vector<16x1xf32>
    %12 = arith.divf %10, %11 : vector<16x1xf32>
    %cst_6 = arith.constant 9.99999974E-6 : f32
    %13 = vector.broadcast %cst_6 : f32 to vector<16x1xf32>
    %14 = arith.addf %12, %13 : vector<16x1xf32>
    %15 = math.rsqrt %14 : vector<16x1xf32>
    %16 = vector.broadcast %15 : vector<16x1xf32> to vector<16x32xf32>
    %17 = arith.mulf %7, %16 : vector<16x32xf32>
    %18 = vector.extract_strided_slice %1 {offsets = [0, 0], sizes = [1, 32], strides = [1, 1]} : vector<2x32xf32> to vector<1x32xf32>
    %19 = vector.broadcast %18 : vector<1x32xf32> to vector<16x32xf32>
    %20 = arith.mulf %17, %19 : vector<16x32xf32>
    %21 = vector.extract_strided_slice %1 {offsets = [1, 0], sizes = [1, 32], strides = [1, 1]} : vector<2x32xf32> to vector<1x32xf32>
    %22 = vector.broadcast %21 : vector<1x32xf32> to vector<16x32xf32>
    %23 = arith.addf %20, %22 : vector<16x32xf32>
    %24 = arith.truncf %23 : vector<16x32xf32> to vector<16x32xbf16>
    %c0_7 = arith.constant 0 : index
    %c0_8 = arith.constant 0 : index
    %25 = vector.load %arg3[%c0_7, %c0_8] : memref<32x128xbf16, #tpu.memory_space<vmem>>, vector<32x128xbf16>
    %cst_9 = arith.constant dense<0.000000e+00> : vector<16x128xf32>
    %26 = tpu.matmul %24, %25, %cst_9 {dimension_numbers = #tpu.dot_dimension_numbers<[1], [0], [0], [1], [0, 0, 1, 1], [], []>} : vector<16x32xbf16>, vector<32x128xbf16>, vector<16x128xf32> -> vector<16x128xf32>
    %c0_10 = arith.constant 0 : index
    %c0_11 = arith.constant 0 : index
    %27 = vector.load %arg4[%c0_10, %c0_11] : memref<16x128xf32, #tpu.memory_space<vmem>>, vector<16x128xf32>
    tpu.vector_store %arg4[%c0_10, %c0_11], %26 {strides = array<i32>} : memref<16x128xf32, #tpu.memory_space<vmem>>, vector<16x128xf32>,
    return
  }
  func.func @transform_0(%arg0: i32) -> (i32, i32) {
    %c0_i32 = arith.constant 0 : i32
    %c0_i32_0 = arith.constant 0 : i32
    return %arg0, %c0_i32 : i32, i32
  }
  func.func @transform_1(%arg0: i32) -> (i32, i32) {
    %c0_i32 = arith.constant 0 : i32
    %c0_i32_0 = arith.constant 0 : i32
    %c0_i32_1 = arith.constant 0 : i32
    return %c0_i32, %c0_i32_0 : i32, i32
  }
  func.func @transform_2(%arg0: i32) -> (i32, i32) {
    %c0_i32 = arith.constant 0 : i32
    %c0_i32_0 = arith.constant 0 : i32
    %c0_i32_1 = arith.constant 0 : i32
    return %c0_i32, %c0_i32_0 : i32, i32
  }
  func.func @transform_3(%arg0: i32) -> (i32, i32) {
    %c0_i32 = arith.constant 0 : i32
    %c0_i32_0 = arith.constant 0 : i32
    return %arg0, %c0_i32 : i32, i32
  }
}

</mosaic_0001>

<bundles_post_ra>
// kernel: tpu_custom_call.1
= control target key start
LH: loop header
LB: loop body
LE: loop exit
PB: predicated region body
PF: predicated region fallthrough
CT: control target
= control target key end

     0   :  { %8 = vsyncpa [#allocation3], 0  ;;  %s358_s0 = inlined_call_operand.hbm [shape: f32[16,32], index: 0, kind: input, shape index: {}]   ;;  %s359_s1 = inlined_call_operand.hbm [shape: f32[2,32], index: 1, kind: input, shape index: {}]   ;;  %s360_s2 = inlined_call_operand.hbm [shape: bf16[32,128], index: 2, kind: input, shape index: {}]   ;;  %s361_s3 = inlined_call_operand.hbm [shape: f32[16,128], index: 3, kind: output, shape index: {}]  }
   0x1   :  { %9 = vsyncpa [#allocation6], 0  ;;  %s29_s14 = sshll.u32 %s359_s1, 4  ;;  %s30_s14 = int_to_ptr.hbm [resolvable:$true] %s29_s14 }
   0x2   :  { %10 = vsyncpa [#allocation4], 0  ;;  %s306_s15 = smov [#allocation5]   ;;  %s15_s19 = sshll.u32 %s358_s0, 4  ;;  %s16_s19 = int_to_ptr.hbm [resolvable:$true] %s15_s19 }
   0x3   :  { %s31_s16 = sshll.u32 %s306_s15, 4  ;;  %s307_s20 = smov [#allocation2]   ;;  %s32_s16 = int_to_ptr.vmem [resolvable:$true] %s31_s16 }
   0x4   :  { %34 = dma.hbm_to_vmem [thread:$0]  %s30_s14, 32, %s32_s16, [#allocation6]  }
   0x5   :  { %s17_s21 = sshll.u32 %s307_s20, 4  ;;  %s308_s22 = smov 128   ;;  %s18_s21 = int_to_ptr.vmem [resolvable:$true] %s17_s21 }
   0x6   :  { %s309_s23 = smov 8   ;;  %s39_s25 = sshll.u32 %s360_s2, 4  ;;  %s40_s25 = int_to_ptr.hbm [resolvable:$true] %s39_s25 }
   0x7   :  { %23 = dma.hbm_to_vmem [thread:$0]  %s16_s19, 256, %s18_s21, [#allocation3], %s308_s22, %s308_s22, %s309_s23  }
   0x8   :  { %s310_s26 = smov [#allocation7]   ;;  %s311_s0 = smov 64  }
   0x9   :  { %s41_s27 = sshll.u32 %s310_s26, 4  ;;  %s312_s28 = smov 4   ;;  %s42_s27 = int_to_ptr.vmem [resolvable:$true] %s41_s27 }
   0xa   :  { %47 = dma.hbm_to_vmem [thread:$0]  %s40_s25, 256, %s42_s27, [#allocation6], %s311_s0, %s311_s0, %s312_s28  }
   0xb   :  { %300 = dma.done.wait [#allocation3], 256  }
   0xc   :  { %301 = vsyncadd [#allocation3], 4294967040 }
   0xd   :  { %302 = dma.done.wait [#allocation6], 288  }
   0xe   :  { %303 = vsyncadd [#allocation6], 4294967008  ;;  %vm64_vm0 = vcmask 261120   ;;  %v61_v0 = vld [vmem:[#allocation2] sm:$0xff]  ;;  %v62_v2 = vld [vmem:[#allocation2 + $0x8] sm:$0xff]  ;;  %v313_v4 = vmov 32.0  }
   0xf   :  { %v65_v1 = vsel %vm64_vm0, %v61_v0, 0.0  ;;  %v68_v3 = vsel %vm64_vm0, %v62_v2, 0.0  ;;  %198 = vrcp.f32 %v313_v4  ;;  %v188_v21 = vld [vmem:[#allocation7 + $0x8] sm:$0xff]  ;;  %v187_v23 = vld [vmem:[#allocation7] sm:$0xff]  ;;  %v63_v40 = vld [vmem:[#allocation5] sm:$0x3] }
  0x10   :  { %66 = vadd.xlane.f32.xlu0 %v65_v1  ;;  %148 = vmatpush.bf16.msra.mxu0 %v188_v21  ;;  %v116_v43 = vperm.slane %v63_v40, 0  ;;  %v119_v48 = vperm.slane %v63_v40, 1  ;;  %s314_s2 = smov [#allocation8]   ;;  %s164_s5 = sshll.u32 %s361_s3, 4  ;;  %s165_s5 = int_to_ptr.hbm [resolvable:$true] %s164_s5 }
  0x11   :  { %s162_s29 = sshll.u32 %s314_s2, 4  ;;  %s163_s29 = int_to_ptr.vmem [resolvable:$true] %s162_s29 }
  0x14   :  { %149 = vmatpush.bf16.msra.mxu0 %v187_v23 }
  0x15   :  { %v199_v5 = vpop.eup %198 }
  0x16   :  { %v72_v6 = vmul.f32 32.0, %v199_v5  ;;  %vm76_vm1 = vweird.f32 %v199_v5 }
  0x18   :  { %69 = vadd.xlane.f32.xlu0 %v68_v3  ;;  %v73_v7 = vsub.f32 1.0, %v72_v6 }
  0x1a   :  { %v74_v8 = vmul.f32 %v199_v5, %v73_v7 }
  0x1c   :  { %v75_v9 = vadd.f32 %v199_v5, %v74_v8 }
  0x1e   :  { %v77_v10 = vsel %vm76_vm1, %v199_v5, %v75_v9 }
  0x83   :  { %v67_v11 = vpop.xlane.xlu0 %66 }
  0x84   :  { %v78_v12 = vmul.f32 %v77_v10, %v67_v11 }
  0x86   :  { %v80_v13 = vsub.f32 %v61_v0, %v78_v12 }
  0x88   :  { %v82_v14 = vmul.f32 %v80_v13, %v80_v13 }
  0x8a   :  { %v84_v15 = vsel %vm64_vm0, %v82_v14, 0.0 }
  0x8b   :  { %85 = vadd.xlane.f32.xlu1 %v84_v15  ;;  %v70_v16 = vpop.xlane.xlu0 %69 }
  0x8c   :  { %v79_v17 = vmul.f32 %v77_v10, %v70_v16 }
  0x8e   :  { %v81_v18 = vsub.f32 %v62_v2, %v79_v17 }
  0x90   :  { %v83_v19 = vmul.f32 %v81_v18, %v81_v18 }
  0x92   :  { %v87_v20 = vsel %vm64_vm0, %v83_v19, 0.0 }
  0x93   :  { %88 = vadd.xlane.f32.xlu1 %v87_v20 }
  0xfe   :  { %v86_v22 = vpop.xlane.xlu1 %85 }
  0xff   :  { %v90_v24 = vmul.f32 %v86_v22, %v77_v10 }
 0x101   :  { %v92_v25 = vadd.f32 1e-05, %v90_v24 }
 0x103   :  { %200 = vrsqrt.f32 %v92_v25  ;;  %vm100_vm3 = vweird.f32 %v92_v25 }
 0x106   :  { %v89_v26 = vpop.xlane.xlu1 %88 }
 0x107   :  { %v91_v27 = vmul.f32 %v89_v26, %v77_v10 }
 0x109   :  { %v201_v28 = vpop.eup %200  ;;  %v93_v29 = vadd.f32 1e-05, %v91_v27 }
 0x10a   :  { %v95_v30 = vmul.f32 %v201_v28, %v92_v25  ;;  %vm101_vm2 = vweird.f32 %v201_v28 }
 0x10b   :  { %202 = vrsqrt.f32 %v93_v29  ;;  %vm102_vm4 = vmor %vm100_vm3, %vm101_vm2  ;;  %vm110_vm6 = vweird.f32 %v93_v29 }
 0x10c   :  { %v96_v31 = vmul.f32 %v201_v28, %v95_v30 }
 0x10e   :  { %v97_v32 = vmul.f32 0.5, %v96_v31 }
 0x110   :  { %v98_v33 = vsub.f32 1.5, %v97_v32 }
 0x111   :  { %v203_v34 = vpop.eup %202 }
 0x112   :  { %v99_v35 = vmul.f32 %v201_v28, %v98_v33  ;;  %v105_v36 = vmul.f32 %v203_v34, %v93_v29  ;;  %vm111_vm5 = vweird.f32 %v203_v34 }
 0x113   :  { %vm112_vm7 = vmor %vm110_vm6, %vm111_vm5 }
 0x114   :  { %v106_v37 = vmul.f32 %v203_v34, %v105_v36  ;;  %v103_v38 = vsel %vm102_vm4, %v201_v28, %v99_v35 }
 0x115   :  { %v114_v42 = vmul.f32 %v103_v38, %v80_v13 }
 0x116   :  { %v107_v39 = vmul.f32 0.5, %v106_v37 }
 0x117   :  { %v117_v47 = vmul.f32 %v116_v43, %v114_v42 }
 0x118   :  { %v108_v41 = vsub.f32 1.5, %v107_v39 }
 0x119   :  { %v120_v50 = vadd.f32 %v119_v48, %v117_v47 }
 0x11a   :  { %v109_v44 = vmul.f32 %v203_v34, %v108_v41 }
 0x11c   :  { %v113_v45 = vsel %vm112_vm7, %v203_v34, %v109_v44 }
 0x11d   :  { %v115_v46 = vmul.f32 %v113_v45, %v81_v18 }
 0x11f   :  { %v118_v49 = vmul.f32 %v116_v43, %v115_v46 }
 0x121   :  { %v121_v51 = vadd.f32 %v119_v48, %v118_v49 }
 0x123   :  { %v122_v52 = vpack.c.bf16 %v121_v51, %v120_v50 }
 0x125   :  { %186 = vmatmul.msk.bf16.vlgmr.msra.gmra.mxu0 %vm64_vm0, %v122_v52 }
 0x1a2   :  { %v151_v53 = vpop.f32.mrf.mxu0 }
 0x1a3   :  { %156 = vst [vmem:[#allocation8] sm:$0xff] %v151_v53 }
 0x1aa   :  { %v153_v54 = vpop.f32.mrf.mxu0 }
 0x1ab   :  { %157 = vst [vmem:[#allocation8 + $0x8] sm:$0xff] %v153_v54 }
 0x1ac   :  { %170 = dma.vmem_to_hbm [thread:$0]  %s163_s29, 256, %s165_s5, [#allocation4], %s308_s22, %s308_s22, %s309_s23  }
 0x1ad   :  { %304 = dma.done.wait [#allocation4], 256  }
 0x1ae   :  { %305 = vsyncadd [#allocation4], 4294967040 }
 0x1af   :  { %175 = vsyncpa [#allocation3], 1 }
 0x1b0   :  { %176 = vsyncpa [#allocation6], 1 }
 0x1b1   :  { %177 = vsyncpa [#allocation4], 1 }

</bundles_post_ra>
